<compile_context>
chip_gen: v7x
topology: tpu7x:2x2x1
jax: 0.10.0
libtpu: 0.0.40
codegen_flags: <defaults>
</compile_context>

<pallas_src>
import functools

import jax
import jax.numpy as jnp
from jax.experimental import pallas as pl
from jax.experimental.pallas import tpu as pltpu

INPUT_SIZE = 542
HIDDEN = 50
NUM_CLASSES = 2

# Default batch-tile size. x stays f32 in HBM (cast to bf16 in-kernel), so a
# 4096-row tile is 4096 * 640(lane-padded) * 4 B = 10 MiB; 3-deep buffering of x
# plus double-buffered output and resident weights is ~35 MiB, inside the
# explicit 48 MiB VMEM limit below on every generation.
DEFAULT_BLOCK_ROWS = 4096
VMEM_LIMIT_BYTES = 48 * 1024 * 1024


def _round_up(x, m):
    return (x + m - 1) // m * m


def mlp_kernel(x_ref, w1_ref, b1_ref, w2_ref, b2_ref, o_ref):
    # x_ref:  (TB, 542) f32      w1_ref: (542, 50) bf16   b1_ref: (1, 50) f32
    # w2_ref: (50, 2)   f32      b2_ref: (1, 2)    f32    o_ref:  (TB, 2) f32
    # Cast x to bf16 in-register (halves MXU input width); accumulate in f32.
    x_bf = x_ref[...].astype(jnp.bfloat16)
    h = jnp.dot(x_bf, w1_ref[...], preferred_element_type=jnp.float32)
    h = jnp.maximum(h + b1_ref[...], 0.0)  # bias + ReLU in f32
    out = jnp.dot(h, w2_ref[...], preferred_element_type=jnp.float32) + b2_ref[...]
    o_ref[...] = out.astype(o_ref.dtype)


@functools.partial(jax.jit, static_argnames=("block_rows",))
def mlp_forward(x, w1, b1, w2, b2, *, block_rows=DEFAULT_BLOCK_ROWS):
    """x: (batch, INPUT_SIZE) f32 (or bf16); returns (batch, NUM_CLASSES) f32."""
    batch, in_f = x.shape
    assert in_f == INPUT_SIZE

    if batch <= block_rows:
        tb = batch                      # single (possibly ragged) full-extent block
    else:
        tb = _round_up(min(block_rows, batch), 16)  # bf16 sublane pack = 16
    n_tiles = pl.cdiv(batch, tb)

    # Tiny parameter arrays: cast/reshape cost is negligible and done once.
    w1_b = w1.astype(jnp.bfloat16)
    b1_r = b1.reshape(1, HIDDEN).astype(jnp.float32)
    w2_r = w2.astype(jnp.float32)
    b2_r = b2.reshape(1, NUM_CLASSES).astype(jnp.float32)

    # x BlockSpec: batch-tiled, full-extent (542) last dim -> no lane-pad copy.
    # 3-deep buffering keeps the DMA queue full; only worth it with >=3 tiles.
    x_spec_kwargs = {}
    if n_tiles >= 3:
        x_spec_kwargs["pipeline_mode"] = pl.Buffered(3)
    x_spec = pl.BlockSpec((tb, INPUT_SIZE), lambda i: (i, 0), **x_spec_kwargs)

    flops = 2 * batch * (INPUT_SIZE * HIDDEN + HIDDEN * NUM_CLASSES)
    bytes_accessed = (
        batch * INPUT_SIZE * x.dtype.itemsize          # x read (dominant)
        + INPUT_SIZE * HIDDEN * 2                      # w1 (bf16)
        + HIDDEN * 4 + HIDDEN * NUM_CLASSES * 4 + NUM_CLASSES * 4
        + batch * NUM_CLASSES * 4                      # output write
    )

    out = pl.pallas_call(
        mlp_kernel,
        out_shape=jax.ShapeDtypeStruct((batch, NUM_CLASSES), jnp.float32),
        grid_spec=pltpu.PrefetchScalarGridSpec(
            num_scalar_prefetch=0,
            grid=(n_tiles,),
            in_specs=[
                x_spec,
                # Weights / biases: whole arrays, VMEM-resident across tiles.
                pl.BlockSpec((INPUT_SIZE, HIDDEN), lambda i: (0, 0)),
                pl.BlockSpec((1, HIDDEN), lambda i: (0, 0)),
                pl.BlockSpec((HIDDEN, NUM_CLASSES), lambda i: (0, 0)),
                pl.BlockSpec((1, NUM_CLASSES), lambda i: (0, 0)),
            ],
            out_specs=pl.BlockSpec((tb, NUM_CLASSES), lambda i: (i, 0)),
        ),
        compiler_params=pltpu.CompilerParams(
            dimension_semantics=("parallel",),
            vmem_limit_bytes=VMEM_LIMIT_BYTES,
        ),
        cost_estimate=pl.CostEstimate(
            flops=flops, transcendentals=0, bytes_accessed=bytes_accessed
        ),
    )(x, w1_b, b1_r, w2_r, b2_r)

    return out


def init_params(key):
    """Deterministic param init mirroring nn.Linear default (uniform +-1/sqrt(fan_in))."""
    k1, k2, k3, k4 = jax.random.split(key, 4)
    bound1 = 1.0 / jnp.sqrt(jnp.float32(INPUT_SIZE))
    bound2 = 1.0 / jnp.sqrt(jnp.float32(HIDDEN))
    # stored as (in_features, out_features)
    w1 = jax.random.uniform(k1, (INPUT_SIZE, HIDDEN), jnp.float32, -bound1, bound1)
    b1 = jax.random.uniform(k2, (HIDDEN,), jnp.float32, -bound1, bound1)
    w2 = jax.random.uniform(k3, (HIDDEN, NUM_CLASSES), jnp.float32, -bound2, bound2)
    b2 = jax.random.uniform(k4, (NUM_CLASSES,), jnp.float32, -bound2, bound2)
    return w1, b1, w2, b2


if __name__ == "__main__":
    key = jax.random.PRNGKey(0)
    kx, kp = jax.random.split(key)

    w1, b1, w2, b2 = init_params(kp)

    # Small-batch check (single grid step, ragged full-extent block).
    batch = 4
    x = jax.random.normal(kx, (batch, INPUT_SIZE), jnp.float32)
    out = jax.block_until_ready(mlp_forward(x, w1, b1, w2, b2))
    ref = jnp.maximum(x @ w1 + b1, 0.0) @ w2 + b2
    assert out.shape == (batch, NUM_CLASSES)
    # bf16 MXU inputs with f32 accumulation -> slightly looser tolerance.
    assert jnp.allclose(out, ref, atol=2e-2, rtol=2e-2), "mismatch vs reference (small batch)"

    # Multi-tile path: grid of 3, ragged last block, Buffered(3) on x.
    batch2 = 40
    x2 = jax.random.normal(kx, (batch2, INPUT_SIZE), jnp.float32)
    out2 = jax.block_until_ready(mlp_forward(x2, w1, b1, w2, b2, block_rows=16))
    ref2 = jnp.maximum(x2 @ w1 + b1, 0.0) @ w2 + b2
    assert out2.shape == (batch2, NUM_CLASSES)
    assert jnp.allclose(out2, ref2, atol=2e-2, rtol=2e-2), "mismatch vs reference (tiled batch)"

    print("KERNEL_OK")
</pallas_src>

<mosaic_0001>
module attributes {stable_mosaic.version = 11 : i64} {
  func.func @mlp_kernel(%arg0: i32, %arg1: memref<4x542xf32, #tpu.memory_space<vmem>>, %arg2: memref<542x50xbf16, #tpu.memory_space<vmem>>, %arg3: memref<1x50xf32, #tpu.memory_space<vmem>>, %arg4: memref<50x2xf32, #tpu.memory_space<vmem>>, %arg5: memref<1x2xf32, #tpu.memory_space<vmem>>, %arg6: memref<4x2xf32, #tpu.memory_space<vmem>>) attributes {dimension_semantics = [#tpu.dimension_semantics<parallel>], iteration_bounds = array<i64: 1>, scalar_prefetch = 0 : i64, scratch_operands = 0 : i64, tpu.core_type = #tpu.core_type<tc>, window_params = [{transform_indices = @transform_0, window_bounds = array<i64: 4, 542>}, {pipeline_mode = #tpu.pipeline_mode<synchronous>, transform_indices = @transform_1, window_bounds = array<i64: 542, 50>}, {pipeline_mode = #tpu.pipeline_mode<synchronous>, transform_indices = @transform_2, window_bounds = array<i64: 1, 50>}, {pipeline_mode = #tpu.pipeline_mode<synchronous>, transform_indices = @transform_3, window_bounds = array<i64: 50, 2>}, {pipeline_mode = #tpu.pipeline_mode<synchronous>, transform_indices = @transform_4, window_bounds = array<i64: 1, 2>}, {transform_indices = @transform_5, window_bounds = array<i64: 4, 2>}]} {
    %c0 = arith.constant 0 : index
    %c0_0 = arith.constant 0 : index
    %0 = vector.load %arg1[%c0, %c0_0] : memref<4x542xf32, #tpu.memory_space<vmem>>, vector<4x542xf32>
    %1 = arith.truncf %0 : vector<4x542xf32> to vector<4x542xbf16>
    %c0_1 = arith.constant 0 : index
    %c0_2 = arith.constant 0 : index
    %2 = vector.load %arg2[%c0_1, %c0_2] : memref<542x50xbf16, #tpu.memory_space<vmem>>, vector<542x50xbf16>
    %cst = arith.constant dense<0.000000e+00> : vector<4x50xf32>
    %3 = tpu.matmul %1, %2, %cst {dimension_numbers = #tpu.dot_dimension_numbers<[1], [0], [0], [1], [0, 0, 1, 1], [], []>} : vector<4x542xbf16>, vector<542x50xbf16>, vector<4x50xf32> -> vector<4x50xf32>
    %c0_3 = arith.constant 0 : index
    %c0_4 = arith.constant 0 : index
    %4 = vector.load %arg3[%c0_3, %c0_4] : memref<1x50xf32, #tpu.memory_space<vmem>>, vector<1x50xf32>
    %5 = vector.broadcast %4 : vector<1x50xf32> to vector<4x50xf32>
    %6 = arith.addf %3, %5 : vector<4x50xf32>
    %cst_5 = arith.constant 0.000000e+00 : f32
    %7 = vector.broadcast %cst_5 : f32 to vector<4x50xf32>
    %8 = arith.maximumf %6, %7 : vector<4x50xf32>
    %c0_6 = arith.constant 0 : index
    %c0_7 = arith.constant 0 : index
    %9 = vector.load %arg4[%c0_6, %c0_7] : memref<50x2xf32, #tpu.memory_space<vmem>>, vector<50x2xf32>
    %cst_8 = arith.constant dense<0.000000e+00> : vector<4x2xf32>
    %10 = tpu.matmul %8, %9, %cst_8 {dimension_numbers = #tpu.dot_dimension_numbers<[1], [0], [0], [1], [0, 0, 1, 1], [], []>} : vector<4x50xf32>, vector<50x2xf32>, vector<4x2xf32> -> vector<4x2xf32>
    %c0_9 = arith.constant 0 : index
    %c0_10 = arith.constant 0 : index
    %11 = vector.load %arg5[%c0_9, %c0_10] : memref<1x2xf32, #tpu.memory_space<vmem>>, vector<1x2xf32>
    %12 = vector.broadcast %11 : vector<1x2xf32> to vector<4x2xf32>
    %13 = arith.addf %10, %12 : vector<4x2xf32>
    %c0_11 = arith.constant 0 : index
    %c0_12 = arith.constant 0 : index
    %14 = vector.load %arg6[%c0_11, %c0_12] : memref<4x2xf32, #tpu.memory_space<vmem>>, vector<4x2xf32>
    tpu.vector_store %arg6[%c0_11, %c0_12], %13 {strides = array<i32>} : memref<4x2xf32, #tpu.memory_space<vmem>>, vector<4x2xf32>,
    return
  }
  func.func @transform_0(%arg0: i32) -> (i32, i32) {
    %c0_i32 = arith.constant 0 : i32
    %c0_i32_0 = arith.constant 0 : i32
    return %arg0, %c0_i32 : i32, i32
  }
  func.func @transform_1(%arg0: i32) -> (i32, i32) {
    %c0_i32 = arith.constant 0 : i32
    %c0_i32_0 = arith.constant 0 : i32
    %c0_i32_1 = arith.constant 0 : i32
    return %c0_i32, %c0_i32_0 : i32, i32
  }
  func.func @transform_2(%arg0: i32) -> (i32, i32) {
    %c0_i32 = arith.constant 0 : i32
    %c0_i32_0 = arith.constant 0 : i32
    %c0_i32_1 = arith.constant 0 : i32
    return %c0_i32, %c0_i32_0 : i32, i32
  }
  func.func @transform_3(%arg0: i32) -> (i32, i32) {
    %c0_i32 = arith.constant 0 : i32
    %c0_i32_0 = arith.constant 0 : i32
    %c0_i32_1 = arith.constant 0 : i32
    return %c0_i32, %c0_i32_0 : i32, i32
  }
  func.func @transform_4(%arg0: i32) -> (i32, i32) {
    %c0_i32 = arith.constant 0 : i32
    %c0_i32_0 = arith.constant 0 : i32
    %c0_i32_1 = arith.constant 0 : i32
    return %c0_i32, %c0_i32_0 : i32, i32
  }
  func.func @transform_5(%arg0: i32) -> (i32, i32) {
    %c0_i32 = arith.constant 0 : i32
    %c0_i32_0 = arith.constant 0 : i32
    return %arg0, %c0_i32 : i32, i32
  }
}

</mosaic_0001>

<bundles_post_ra>
// kernel: mlp_forward.1
= control target key start
LH: loop header
LB: loop body
LE: loop exit
PB: predicated region body
PF: predicated region fallthrough
CT: control target
= control target key end

     0   :  { %v707_v34 = vmov 0.0   ;;  %v708_v39 = vmov 0.0|0.0   ;;  %vm317_vm0 = vcmask 1046528   ;;  %vm709_vm1 = vmmov 0   ;;  %s881_s1 = inlined_call_operand.vmem [shape: bf16[542,50], index: 1, kind: input, shape index: {}]   ;;  %s882_s0 = inlined_call_operand.vmem [shape: f32[4,542], index: 0, kind: input, shape index: {}]   ;;  %s883_s3 = inlined_call_operand.vmem [shape: f32[50,2], index: 3, kind: input, shape index: {}]   ;;  %s884_s2 = inlined_call_operand.vmem [shape: f32[1,50], index: 2, kind: input, shape index: {}]   ;;  %s885_s4 = inlined_call_operand.vmem [shape: f32[1,2], index: 4, kind: input, shape index: {}]   ;;  %s886_s5 = inlined_call_operand.vmem [shape: f32[4,2], index: 5, kind: output, shape index: {}]  }
   0x1   :  { %v671_v0 = vld [vmem:[%s881_s1 + $0x40] sm:$0xff]   ;;  %v675_v4 = vld [vmem:[%s881_s1 + $0x48] sm:$0xff]   ;;  %v679_v8 = vld [vmem:[%s881_s1 + $0x50] sm:$0xff]   ;;  %vm313_vm2 = vcmask 244736   ;;  %vm460_vm3 = vcmask 1041408   ;;  %vm456_vm4 = vcmask 408576  }
   0x2   :  { %v672_v1 = vld [vmem:[%s881_s1] sm:$0xff]   ;;  %579 = vmatprep.subr.bf16.mxu0 %v671_v0  ;;  %v676_v5 = vld [vmem:[%s881_s1 + $0x8] sm:$0xff]   ;;  %v680_v9 = vld [vmem:[%s881_s1 + $0x10] sm:$0xff]   ;;  %vm534_vm5 = vcmask 11264  }
   0x3   :  { %v673_v2 = vld [vmem:[%s881_s1 + $0xc0] sm:$0xff]   ;;  %580 = vmatpush3.bf16.msra.mxu0 %v672_v1  ;;  %v677_v6 = vld [vmem:[%s881_s1 + $0xc8] sm:$0xff]   ;;  %v681_v10 = vld [vmem:[%s881_s1 + $0xd0] sm:$0xff]  }
   0x4   :  { %v674_v3 = vld [vmem:[%s881_s1 + $0x80] sm:$0xff]   ;;  %601 = vmatprep.subr.bf16.mxu1 %v673_v2  ;;  %581 = vmatprep.subr.bf16.mxu0 %v675_v4  ;;  %v678_v7 = vld [vmem:[%s881_s1 + $0x88] sm:$0xff]   ;;  %v682_v11 = vld [vmem:[%s881_s1 + $0x90] sm:$0xff]  }
   0x5   :  { %602 = vmatpush3.bf16.msra.mxu1 %v674_v3  ;;  %v683_v12 = vld [vmem:[%s881_s1 + $0x58] sm:$0xff]   ;;  %v687_v16 = vld [vmem:[%s881_s1 + $0x60] sm:$0xff]   ;;  %v691_v20 = vld [vmem:[%s881_s1 + $0x68] sm:$0xff]  }
   0x6   :  { %603 = vmatprep.subr.bf16.mxu1 %v677_v6  ;;  %v684_v13 = vld [vmem:[%s881_s1 + $0x18] sm:$0xff]   ;;  %v688_v17 = vld [vmem:[%s881_s1 + $0x20] sm:$0xff]   ;;  %v692_v21 = vld [vmem:[%s881_s1 + $0x28] sm:$0xff]  }
   0x7   :  { %582 = vmatpush3.bf16.msra.mxu0 %v676_v5  ;;  %v685_v14 = vld [vmem:[%s881_s1 + $0xd8] sm:$0xff]   ;;  %v689_v18 = vld [vmem:[%s881_s1 + $0xe0] sm:$0xff]   ;;  %v693_v22 = vld [vmem:[%s881_s1 + $0xe8] sm:$0xff]  }
   0x8   :  { %583 = vmatprep.subr.bf16.mxu0 %v679_v8  ;;  %v686_v15 = vld [vmem:[%s881_s1 + $0x98] sm:$0xff]   ;;  %v690_v19 = vld [vmem:[%s881_s1 + $0xa0] sm:$0xff]   ;;  %v694_v23 = vld [vmem:[%s881_s1 + $0xa8] sm:$0xff]  }
   0x9   :  { %604 = vmatpush3.bf16.msra.mxu1 %v678_v7  ;;  %v695_v24 = vld [vmem:[%s881_s1 + $0x70] sm:$0xff]   ;;  %v699_v28 = vld [vmem:[%s881_s1 + $0x78] sm:$0xff]   ;;  %v21_v32 = vld [vmem:[%s882_s0] sm:$0xff] }
   0xa   :  { %605 = vmatprep.subr.bf16.mxu1 %v681_v10  ;;  %v696_v25 = vld [vmem:[%s881_s1 + $0x30] sm:$0xff]   ;;  %v700_v29 = vld [vmem:[%s881_s1 + $0x38] sm:$0xff]   ;;  %v22_v33 = vld [vmem:[%s882_s0 + $0x8] sm:$0xff]  ;;  %v26_v35 = vcombine.high %v21_v32, %v21_v32  ;;  %v30_v37 = vpack.c.bf16 %v21_v32, %v21_v32 }
   0xb   :  { %584 = vmatpush3.bf16.msra.mxu0 %v680_v9  ;;  %v697_v26 = vld [vmem:[%s881_s1 + $0xf0] sm:$0xff]   ;;  %v701_v30 = vld [vmem:[%s881_s1 + $0xf8] sm:$0xff]   ;;  %v27_v36 = vcombine.high %v22_v33, %v22_v33  ;;  %v32_v38 = vpack.c.bf16 %v22_v33, %v22_v33  ;;  %v705_v42 = vld [vmem:[%s881_s1 + $0x100] sm:$0xff]  }
   0xc   :  { %585 = vmatprep.subr.bf16.mxu0 %v683_v12  ;;  %v698_v27 = vld [vmem:[%s881_s1 + $0xb0] sm:$0xff]   ;;  %v702_v31 = vld [vmem:[%s881_s1 + $0xb8] sm:$0xff]   ;;  %v31_v40 = vpack.c.bf16 %v26_v35, %v26_v35  ;;  %v706_v43 = vld [vmem:[%s881_s1 + $0x108] sm:$0x7f]  }
   0xd   :  { %606 = vmatpush3.bf16.msra.mxu1 %v682_v11  ;;  %v33_v41 = vpack.c.bf16 %v27_v36, %v27_v36  ;;  %v23_v44 = vld [vmem:[%s882_s0 + $0x10] sm:$0xf]  ;;  %v319_v45 = vsel %vm317_vm0, %v706_v43, 0  ;;  %v442_v47 = vld [vmem:[%s883_s3] sm:$0xff]  ;;  %v443_v48 = vld [vmem:[%s883_s3 + $0x8] sm:$0xff] }
   0xe   :  { %607 = vmatprep.subr.bf16.mxu1 %v685_v14  ;;  %353 = vmatprep.mubr.bf16.mxu0 %v31_v40  ;;  %v34_v46 = vpack.c.bf16 %v23_v44, %v23_v44  ;;  %v660_v49 = vpack.c.bf16 %v443_v48, %v442_v47  ;;  %v444_v50 = vld [vmem:[%s883_s3 + $0x10] sm:$0xff]  ;;  %v445_v51 = vld [vmem:[%s883_s3 + $0x18] sm:$0xff]  ;;  %v446_v53 = vld [vmem:[%s883_s3 + $0x20] sm:$0xff] }
   0xf   :  { %586 = vmatpush3.bf16.msra.mxu0 %v684_v13  ;;  %393 = vmatprep.mubr.bf16.mxu1 %v33_v41  ;;  %v663_v52 = vpack.c.bf16 %v445_v51, %v444_v50  ;;  %v447_v54 = vld [vmem:[%s883_s3 + $0x28] sm:$0xff]  ;;  %v448_v56 = vld [vmem:[%s883_s3 + $0x30] sm:$0x3]  ;;  %v540_v59 = vld [vmem:[%s884_s2] ss:$0 sm:$0xff] }
  0x10   :  { %587 = vmatprep.subr.bf16.mxu0 %v687_v16  ;;  %v666_v55 = vpack.c.bf16 %v447_v54, %v446_v53  ;;  %v576_v12 = vld [vmem:[%s885_s4] ss:$0 sm:$0xff] }
  0x11   :  { %608 = vmatpush3.bf16.msra.mxu1 %v686_v15 }
  0x12   :  { %609 = vmatprep.subr.bf16.mxu1 %v689_v18 }
  0x13   :  { %588 = vmatpush3.bf16.msra.mxu0 %v688_v17 }
  0x14   :  { %589 = vmatprep.subr.bf16.mxu0 %v691_v20 }
  0x15   :  { %610 = vmatpush3.bf16.msra.mxu1 %v690_v19 }
  0x16   :  { %611 = vmatprep.subr.bf16.mxu1 %v693_v22 }
  0x17   :  { %590 = vmatpush3.bf16.msra.mxu0 %v692_v21 }
  0x18   :  { %591 = vmatprep.subr.bf16.mxu0 %v695_v24 }
  0x19   :  { %612 = vmatpush3.bf16.msra.mxu1 %v694_v23 }
  0x1a   :  { %613 = vmatprep.subr.bf16.mxu1 %v697_v26 }
  0x1b   :  { %592 = vmatpush3.bf16.msra.mxu0 %v696_v25 }
  0x1c   :  { %593 = vmatprep.subr.bf16.mxu0 %v699_v28 }
  0x1d   :  { %614 = vmatpush3.bf16.msra.mxu1 %v698_v27 }
  0x1e   :  { %615 = vmatprep.subr.bf16.mxu1 %v701_v30 }
  0x1f   :  { %594 = vmatpush3.bf16.msra.mxu0 %v700_v29 }
  0x20   :  { %634 = vmatprep.subr.bf16.mxu0 %v707_v34 }
  0x21   :  { %616 = vmatpush3.bf16.msra.mxu1 %v702_v31 }
  0x22   :  { %659 = vmatprep.subr.bf16.mxu1 %v708_v39  ;;  %354 = vmatmul.mubr.bf16.vlgmr.msra.gmra.mrb[0].mxu0 %v30_v37 }
  0x23   :  { %635 = vmatpush3.bf16.msra.mxu0 %v705_v42  ;;  %638 = vmatprep.mubr.msk.bf16.mxu0 %vm709_vm1, %v707_v34 }
  0x24   :  { %394 = vmatmul.mubr.bf16.vlgmr.msra.gmra.mrb[0].mxu1 %v32_v38  ;;  %636 = vmatprep.subr.bf16.mxu0 %v707_v34 }
  0x25   :  { %656 = vmatprep.mubr.msk.f32.mxu1 %vm709_vm1, %v707_v34  ;;  %661 = vmatpush3.bf16.msra.mxu1 %v660_v49 }
  0x26   :  { %662 = vmatprep.subr.bf16.mxu1 %v708_v39 }
  0x27   :  { %637 = vmatpush3.bf16.msra.mxu0 %v319_v45 }
  0x29   :  { %664 = vmatpush3.bf16.msra.mxu1 %v663_v52 }
  0x2a   :  { %639 = vmatmul.mubr.msk.bf16.vlgmr.msra.gmra.mrb[4].mxu0 %vm313_vm2, %v34_v46  ;;  %665 = vmatprep.subr.bf16.mxu1 %v708_v39 }
  0x2d   :  { %667 = vmatpush3.bf16.msra.mxu1 %v666_v55 }
  0x2e   :  { %654 = vmatprep.subr.mxu1 %v707_v34 }
  0x31   :  { %655 = vmatpush3.msk.msra.mxu1 %vm460_vm3, %v448_v56 }
  0xf5   :  { %v595_v57 = vpop.f32.mrb[0].mxu0 }
  0xf6   :  { %v596_v60 = vpop.f32.mrb[1].mxu0 }
  0xf7   :  { %v617_v58 = vpop.f32.mrb[0].mxu1  ;;  %v597_v62 = vadd.f32 %v596_v60, %v595_v57  ;;  %v598_v63 = vpop.f32.mrb[2].mxu0 }
  0xf8   :  { %v618_v61 = vpop.f32.mrb[1].mxu1  ;;  %v599_v2 = vpop.f32.mrb[3].mxu0 }
  0xf9   :  { %v619_v0 = vadd.f32 %v618_v61, %v617_v58  ;;  %v620_v1 = vpop.f32.mrb[2].mxu1  ;;  %v356_v4 = vadd.f32 %v597_v62, %v540_v59 }
  0xfa   :  { %v621_v3 = vpop.f32.mrb[3].mxu1 }
  0xfb   :  { %v396_v5 = vadd.f32 %v619_v0, %v356_v4 }
  0xfd   :  { %v435_v6 = vpop.f32.mrb[4].mxu0 }
  0xfe   :  { %v436_v7 = vadd.f32 %v435_v6, %v396_v5  ;;  %v640_v8 = vpop.f32.mrb[5].mxu0 }
  0xff   :  { %v438_v9 = vpop.f32.mrb[6].mxu0 }
 0x100   :  { %v441_v10 = vmax.f32 %v436_v7, 0.0  ;;  %v641_v11 = vpop.f32.mrb[7].mxu0 }
 0x102   :  { %657 = vmatmul.mubr.msk.f32.vlgmr.msra.gmra.mrb[4].mxu1 %vm456_vm4, %v441_v10 }
 0x1d5   :  { %v530_v13 = vpop.f32.mrb[4].mxu1 }
 0x1d6   :  { %v531_v14 = vadd.f32 %v576_v12, %v530_v13  ;;  %v658_v15 = vpop.f32.mrb[5].mxu1 }
 0x1d8   :  { %535 = vst.msk [vmem:[%s886_s5] sm:$0xf] %vm534_vm5, %v531_v14 }

</bundles_post_ra>
